<compile_context>
chip_gen: v5e
topology: v5e:2x2
jax: 0.10.0
libtpu: 0.0.40
codegen_flags: <defaults>
</compile_context>

<pallas_src>
import functools

import numpy as np
import jax
import jax.numpy as jnp
from jax.experimental import pallas as pl
from jax.experimental.pallas import tpu as pltpu


# ----------------------------------------------------------------------------
# Host-side matrices matching PyTorch semantics exactly
# ----------------------------------------------------------------------------
def adaptive_pool_matrix(out_size, in_size):
    """Row-stochastic matrix implementing nn.AdaptiveAvgPool2d along one axis."""
    P = np.zeros((out_size, in_size), dtype=np.float32)
    for i in range(out_size):
        start = (i * in_size) // out_size
        end = ((i + 1) * in_size + out_size - 1) // out_size
        P[i, start:end] = 1.0 / (end - start)
    return P


def bilinear_matrix(out_size, in_size):
    """Matrix implementing F.interpolate(mode='bilinear', align_corners=False)."""
    M = np.zeros((out_size, in_size), dtype=np.float32)
    scale = in_size / out_size
    for i in range(out_size):
        src = max((i + 0.5) * scale - 0.5, 0.0)
        i0 = min(int(np.floor(src)), in_size - 1)
        i1 = min(i0 + 1, in_size - 1)
        lam = src - i0
        M[i, i0] += 1.0 - lam
        M[i, i1] += lam
    return M


def _tap_masks(H, W, nb):
    """(9, 1, nb*H*W) {0,1} masks: tap t = (dy+1)*3 + (dx+1) is valid at the
    flattened position y*W+x iff (y+dy, x+dx) lies inside the image (the 3x3
    conv's zero padding).  Repeated per image of the lane-batched block."""
    HW = H * W
    m = np.zeros((9, HW), np.float32)
    for t in range(9):
        dy, dx = t // 3 - 1, t % 3 - 1
        for y in range(H):
            if not (0 <= y + dy < H):
                continue
            for x in range(W):
                if 0 <= x + dx < W:
                    m[t, y * W + x] = 1.0
    return np.tile(m, (1, nb)).reshape(9, 1, nb * HW)


# ----------------------------------------------------------------------------
# The single fused Pallas kernel (one grid step per NB-image lane block)
# ----------------------------------------------------------------------------
def _psp_fused_kernel(NB, H, W, x_ref, wcat_ref, pool_ref, sbias_ref, smask_ref,
                      up_ref, w3s_ref, b1_ref, tmask_ref, w1_ref, b2_ref, o_ref):
    HW = H * W
    L = NB * HW
    Cmid = b1_ref.shape[0]
    xT = x_ref[...]                                                    # (F, L)

    # ---- pyramid stages: adaptive-pool -> 1x1 conv (BN scale folded into the
    # stacked weights) -> +bias -> ReLU -> block-diagonal stage mask ->
    # bilinear upsample.  All four stages share every matmul.
    priors = []
    for b in range(NB):                                     # NB small, unrolled
        xb = xT[:, b * HW:(b + 1) * HW]                                # (F, HW)
        pooled = jnp.dot(xb, pool_ref[...],
                         preferred_element_type=jnp.float32)          # (F, S2P)
        t1 = jnp.dot(wcat_ref[...], pooled,
                     preferred_element_type=jnp.float32)              # (SC, S2P)
        y = jnp.maximum(t1 + sbias_ref[...], 0.0) * smask_ref[...]
        priors.append(jnp.dot(y, up_ref[...],
                              preferred_element_type=jnp.float32))    # (SC, HW)
    priorsT = priors[0] if NB == 1 else jnp.concatenate(priors, axis=1)
    # concat of the original features (replaces the old 0/1 embedding matmul)
    catT = jnp.concatenate([priorsT, xT], axis=0)                      # (Cin, L)

    # ---- bottleneck 3x3 conv (BN scale folded into w3s): one stacked matmul
    # over all 9 taps, then per-tap lane rolls (XLU) + zero-padding boundary
    # masks (VPU) instead of a dense (HW, HW) shift-matrix im2col.
    Z = jnp.dot(w3s_ref[...], catT,
                preferred_element_type=jnp.float32)                    # (9*Cmid, L)
    acc = Z[4 * Cmid:5 * Cmid, :]                                      # center tap
    for t in range(9):
        if t == 4:
            continue
        dy, dx = t // 3 - 1, t % 3 - 1
        d = dy * W + dx                    # source offset on the flattened lanes
        zt = pltpu.roll(Z[t * Cmid:(t + 1) * Cmid, :], (-d) % L, axis=1)
        acc = acc + zt * tmask_ref[t]                                  # (1, L) mask
    h1 = jnp.maximum(acc + b1_ref[...], 0.0)                           # BN bias + ReLU
    o_ref[...] = (jnp.dot(w1_ref[...], h1,
                          preferred_element_type=jnp.float32)
                  + b2_ref[...])                                       # (Cout, L)


def _pick_nb(n, hw):
    """Images per grid step.  Widen the lane axis (up to ~1024 lanes) to
    amortize per-step overhead, but keep >= 2 grid steps when the batch allows
    it so v7x's two TensorCores both get work."""
    nb = 1
    for cand in range(1, n + 1):
        if n % cand:
            continue
        if cand * hw > 1024:
            break
        if cand == 1 or n // cand >= 2:
            nb = cand
    return nb


def psp_forward(x_nchw, packed):
    """x_nchw: (N, F, H, W) float32.  Returns (N, Cout, H, W) float32."""
    N, F, H, W = x_nchw.shape
    HW = H * W
    Cout = packed["w1"].shape[0]
    Cmid9, Cin = packed["w3s"].shape
    Cmid = Cmid9 // 9
    SC, S2P = packed["smask"].shape

    nb = _pick_nb(N, HW)
    L = nb * HW

    # Channels-on-sublane / (batch*HW)-on-lane layout: one cheap XLA transpose
    # outside the kernel buys full-lane, unmasked loads/stores inside it.
    x2 = jnp.transpose(x_nchw, (1, 0, 2, 3)).reshape(F, N * HW)
    tmask = jnp.asarray(_tap_masks(H, W, nb))                 # (9, 1, L)

    kern = functools.partial(_psp_fused_kernel, nb, H, W)
    const = lambda i: (0, 0)
    out2 = pl.pallas_call(
        kern,
        out_shape=jax.ShapeDtypeStruct((Cout, N * HW), jnp.float32),
        grid=(N // nb,),
        in_specs=[
            pl.BlockSpec((F, L), lambda i: (0, i)),         # features (per lane block)
            pl.BlockSpec((SC, F), const),                   # stacked BN-scaled 1x1 weights
            pl.BlockSpec((HW, S2P), const),                 # stacked adaptive-pool mats^T
            pl.BlockSpec((SC, 1), const),                   # stage BN bias
            pl.BlockSpec((SC, S2P), const),                 # stage block-diagonal mask
            pl.BlockSpec((S2P, HW), const),                 # stacked bilinear mats^T
            pl.BlockSpec((Cmid9, Cin), const),              # 3x3 conv weights, taps stacked
            pl.BlockSpec((Cmid, 1), const),                 # bottleneck BN bias
            pl.BlockSpec((9, 1, L), lambda i: (0, 0, 0)),   # conv boundary masks
            pl.BlockSpec((Cout, Cmid), const),              # final 1x1 conv weight
            pl.BlockSpec((Cout, 1), const),                 # final conv bias
        ],
        out_specs=pl.BlockSpec((Cout, L), lambda i: (0, i)),
        compiler_params=pltpu.CompilerParams(
            dimension_semantics=("parallel",),
            vmem_limit_bytes=32 * 1024 * 1024),
    )(x2, packed["wcat"], packed["poolT"], packed["sbias"], packed["smask"],
      packed["upT"], packed["w3s"], packed["b1"], tmask,
      packed["w1"], packed["b2"])

    return jnp.transpose(out2.reshape(Cout, N, H, W), (1, 0, 2, 3))


# ----------------------------------------------------------------------------
# Parameters (deterministic, synthetic) + folding / packing for the kernel
# ----------------------------------------------------------------------------
def fold_bn(gamma, beta, mean, var, eps=1e-5):
    scale = gamma / jnp.sqrt(var + eps)
    bias = beta - mean * scale
    return scale[None, :], bias[None, :]


def init_params(key, features, out_features, sizes, eps=1e-5):
    C = out_features
    keys = list(jax.random.split(key, 5 * len(sizes) + 7))
    nxt = lambda: keys.pop()

    stage_w, stage_scale, stage_bias = [], [], []
    for _ in sizes:
        wt = 0.05 * jax.random.normal(nxt(), (C, features, 1, 1), jnp.float32)  # torch OIHW
        gamma = 1.0 + 0.1 * jax.random.normal(nxt(), (C,), jnp.float32)
        beta = 0.05 * jax.random.normal(nxt(), (C,), jnp.float32)
        mean = 0.02 * jax.random.normal(nxt(), (C,), jnp.float32)
        var = 1.0 + 0.1 * jnp.abs(jax.random.normal(nxt(), (C,), jnp.float32))
        sc, bi = fold_bn(gamma, beta, mean, var, eps)
        stage_w.append(jnp.transpose(wt[:, :, 0, 0], (1, 0)))                    # (F, C)
        stage_scale.append(sc)
        stage_bias.append(bi)

    cin_total = features + len(sizes) * C
    w3t = 0.05 * jax.random.normal(nxt(), (C, cin_total, 3, 3), jnp.float32)     # torch OIHW
    gamma = 1.0 + 0.1 * jax.random.normal(nxt(), (C,), jnp.float32)
    beta = 0.05 * jax.random.normal(nxt(), (C,), jnp.float32)
    mean = 0.02 * jax.random.normal(nxt(), (C,), jnp.float32)
    var = 1.0 + 0.1 * jnp.abs(jax.random.normal(nxt(), (C,), jnp.float32))
    s1, b1 = fold_bn(gamma, beta, mean, var, eps)
    w1t = 0.05 * jax.random.normal(nxt(), (C, C, 1, 1), jnp.float32)
    b2 = 0.05 * jax.random.normal(nxt(), (C,), jnp.float32)

    return {
        "stage_w": stage_w, "stage_scale": stage_scale, "stage_bias": stage_bias,
        "w3": jnp.transpose(w3t, (2, 3, 1, 0)).reshape(9, cin_total, C),  # tap = ky*3+kx
        "s1": s1, "b1": b1,
        "w1": jnp.transpose(w1t[:, :, 0, 0], (1, 0)),                     # (Cmid, Cout)
        "b2": b2[None, :],
    }


def pack_params(raw, pool_mats_np, up_mats_np, H, W, F, C, sizes):
    """Pack raw (PyTorch-layout) parameters into the fused-kernel constants,
    folding BN scales into the stacked conv weights."""
    nstage = len(sizes)
    SC = nstage * C                       # channels of the concatenated priors
    Cin = SC + F                          # priors + original features
    HW = H * W
    s2s = [s * s for s in sizes]
    S2 = int(np.sum(s2s))
    S2P = ((S2 + 63) // 64) * 64          # pad pooled positions to full lanes
    offs = np.cumsum([0] + s2s)

    wcat = np.zeros((SC, F), np.float32)
    sbias = np.zeros((SC, 1), np.float32)
    smask = np.zeros((SC, S2P), np.float32)
    poolT = np.zeros((HW, S2P), np.float32)
    upT = np.zeros((S2P, HW), np.float32)
    for i in range(nstage):
        w_if = np.asarray(raw["stage_w"][i]).T                 # (C, F)
        sc = np.asarray(raw["stage_scale"][i])[0]              # (C,)
        bi = np.asarray(raw["stage_bias"][i])[0]
        wcat[i * C:(i + 1) * C, :] = sc[:, None] * w_if        # BN scale folded
        sbias[i * C:(i + 1) * C, 0] = bi
        smask[i * C:(i + 1) * C, offs[i]:offs[i + 1]] = 1.0
        poolT[:, offs[i]:offs[i + 1]] = pool_mats_np[i].T      # (HW, s^2)
        upT[offs[i]:offs[i + 1], :] = up_mats_np[i].T          # (s^2, HW)

    raw_w3 = np.asarray(raw["w3"])                             # (9, Cin, Cmid)
    Cmid = raw_w3.shape[-1]
    s1 = np.asarray(raw["s1"])[0]                              # (Cmid,)
    w3s = np.zeros((9 * Cmid, Cin), np.float32)
    for t in range(9):
        w3s[t * Cmid:(t + 1) * Cmid, :] = s1[:, None] * raw_w3[t].T   # BN scale folded

    return {
        "wcat": jnp.asarray(wcat),                             # (SC, F)
        "poolT": jnp.asarray(poolT),                           # (HW, S2P)
        "sbias": jnp.asarray(sbias),                           # (SC, 1)
        "smask": jnp.asarray(smask),                           # (SC, S2P)
        "upT": jnp.asarray(upT),                               # (S2P, HW)
        "w3s": jnp.asarray(w3s),                               # (9*Cmid, Cin)
        "b1": jnp.asarray(np.asarray(raw["b1"]).T),            # (Cmid, 1)
        "w1": jnp.asarray(np.asarray(raw["w1"]).T),            # (Cout, Cmid)
        "b2": jnp.asarray(np.asarray(raw["b2"]).T),            # (Cout, 1)
    }


# ----------------------------------------------------------------------------
# Pure-jnp reference (mirrors the PyTorch forward, uses the RAW parameters)
# ----------------------------------------------------------------------------
def psp_reference(x_nchw, params, pool_mats, up_mats):
    N, F, H, W = x_nchw.shape
    x_flat = jnp.transpose(x_nchw, (0, 2, 3, 1)).reshape(N, H * W, F)
    priors = []
    for i in range(len(pool_mats)):
        pooled = jnp.einsum("ph,nhc->npc", pool_mats[i], x_flat)
        y = jnp.maximum(jnp.einsum("npc,cd->npd", pooled, params["stage_w"][i])
                        * params["stage_scale"][i] + params["stage_bias"][i], 0.0)
        priors.append(jnp.einsum("hp,npd->nhd", up_mats[i], y))
    cat = jnp.concatenate(priors + [x_flat], axis=-1)
    Cin = cat.shape[-1]
    xp = jnp.pad(cat.reshape(N, H, W, Cin), ((0, 0), (1, 1), (1, 1), (0, 0)))
    Cmid = params["w3"].shape[-1]
    acc = jnp.zeros((N, H, W, Cmid), jnp.float32)
    for dy in range(3):
        for dx in range(3):
            acc = acc + jnp.einsum("nhwc,cd->nhwd",
                                   xp[:, dy:dy + H, dx:dx + W, :],
                                   params["w3"][dy * 3 + dx])
    y = jnp.maximum(acc * params["s1"][0] + params["b1"][0], 0.0)
    out = jnp.einsum("nhwc,cd->nhwd", y, params["w1"]) + params["b2"][0]
    return jnp.transpose(out, (0, 3, 1, 2))


# ----------------------------------------------------------------------------
if __name__ == "__main__":
    N, F, H, W = 2, 8, 16, 16          # batch, features, spatial
    C = 16                              # out_features (shrunk from 256)
    sizes = (1, 2, 3, 6)

    key = jax.random.PRNGKey(0)
    kx, kp = jax.random.split(key)
    x = jax.random.normal(kx, (N, F, H, W), dtype=jnp.float32)   # PyTorch NCHW input

    raw = init_params(kp, F, C, sizes)
    pool_np = [np.kron(adaptive_pool_matrix(s, H), adaptive_pool_matrix(s, W)) for s in sizes]
    up_np = [np.kron(bilinear_matrix(H, s), bilinear_matrix(W, s)) for s in sizes]
    packed = pack_params(raw, pool_np, up_np, H, W, F, C, sizes)

    out = jax.block_until_ready(psp_forward(x, packed))

    ref = psp_reference(x, raw,
                        [jnp.asarray(p) for p in pool_np],
                        [jnp.asarray(u) for u in up_np])
    assert out.shape == (N, C, H, W), out.shape
    np.testing.assert_allclose(np.asarray(out), np.asarray(ref), rtol=1e-4, atol=1e-4)
    print("KERNEL_OK")
</pallas_src>

<mosaic_0001>
module attributes {stable_mosaic.version = 11 : i64} {
  func.func @_psp_fused_kernel(%arg0: i32, %arg1: memref<8x256xf32, #tpu.memory_space<vmem>>, %arg2: memref<64x8xf32, #tpu.memory_space<vmem>>, %arg3: memref<256x64xf32, #tpu.memory_space<vmem>>, %arg4: memref<64x1xf32, #tpu.memory_space<vmem>>, %arg5: memref<64x64xf32, #tpu.memory_space<vmem>>, %arg6: memref<64x256xf32, #tpu.memory_space<vmem>>, %arg7: memref<144x72xf32, #tpu.memory_space<vmem>>, %arg8: memref<16x1xf32, #tpu.memory_space<vmem>>, %arg9: memref<9x1x256xf32, #tpu.memory_space<vmem>>, %arg10: memref<16x16xf32, #tpu.memory_space<vmem>>, %arg11: memref<16x1xf32, #tpu.memory_space<vmem>>, %arg12: memref<16x256xf32, #tpu.memory_space<vmem>>) attributes {dimension_semantics = [#tpu.dimension_semantics<parallel>], iteration_bounds = array<i64: 2>, scalar_prefetch = 0 : i64, scratch_operands = 0 : i64, tpu.core_type = #tpu.core_type<tc>, window_params = [{transform_indices = @transform_0, window_bounds = array<i64: 8, 256>}, {pipeline_mode = #tpu.pipeline_mode<synchronous>, transform_indices = @transform_1, window_bounds = array<i64: 64, 8>}, {pipeline_mode = #tpu.pipeline_mode<synchronous>, transform_indices = @transform_2, window_bounds = array<i64: 256, 64>}, {pipeline_mode = #tpu.pipeline_mode<synchronous>, transform_indices = @transform_3, window_bounds = array<i64: 64, 1>}, {pipeline_mode = #tpu.pipeline_mode<synchronous>, transform_indices = @transform_4, window_bounds = array<i64: 64, 64>}, {pipeline_mode = #tpu.pipeline_mode<synchronous>, transform_indices = @transform_5, window_bounds = array<i64: 64, 256>}, {pipeline_mode = #tpu.pipeline_mode<synchronous>, transform_indices = @transform_6, window_bounds = array<i64: 144, 72>}, {pipeline_mode = #tpu.pipeline_mode<synchronous>, transform_indices = @transform_7, window_bounds = array<i64: 16, 1>}, {pipeline_mode = #tpu.pipeline_mode<synchronous>, transform_indices = @transform_8, window_bounds = array<i64: 9, 1, 256>}, {pipeline_mode = #tpu.pipeline_mode<synchronous>, transform_indices = @transform_9, window_bounds = array<i64: 16, 16>}, {pipeline_mode = #tpu.pipeline_mode<synchronous>, transform_indices = @transform_10, window_bounds = array<i64: 16, 1>}, {transform_indices = @transform_11, window_bounds = array<i64: 16, 256>}]} {
    %c0 = arith.constant 0 : index
    %c0_0 = arith.constant 0 : index
    %0 = vector.load %arg1[%c0, %c0_0] : memref<8x256xf32, #tpu.memory_space<vmem>>, vector<8x256xf32>
    %c0_1 = arith.constant 0 : index
    %c0_2 = arith.constant 0 : index
    %1 = vector.load %arg3[%c0_1, %c0_2] : memref<256x64xf32, #tpu.memory_space<vmem>>, vector<256x64xf32>
    %cst = arith.constant dense<0.000000e+00> : vector<8x64xf32>
    %2 = tpu.matmul %0, %1, %cst {dimension_numbers = #tpu.dot_dimension_numbers<[1], [0], [0], [1], [0, 0, 1, 1], [], []>} : vector<8x256xf32>, vector<256x64xf32>, vector<8x64xf32> -> vector<8x64xf32>
    %c0_3 = arith.constant 0 : index
    %c0_4 = arith.constant 0 : index
    %3 = vector.load %arg2[%c0_3, %c0_4] : memref<64x8xf32, #tpu.memory_space<vmem>>, vector<64x8xf32>
    %cst_5 = arith.constant dense<0.000000e+00> : vector<64x64xf32>
    %4 = tpu.matmul %3, %2, %cst_5 {dimension_numbers = #tpu.dot_dimension_numbers<[1], [0], [0], [1], [0, 0, 1, 1], [], []>} : vector<64x8xf32>, vector<8x64xf32>, vector<64x64xf32> -> vector<64x64xf32>
    %c0_6 = arith.constant 0 : index
    %c0_7 = arith.constant 0 : index
    %5 = vector.load %arg4[%c0_6, %c0_7] : memref<64x1xf32, #tpu.memory_space<vmem>>, vector<64x1xf32>
    %6 = vector.broadcast %5 : vector<64x1xf32> to vector<64x64xf32>
    %7 = arith.addf %4, %6 : vector<64x64xf32>
    %cst_8 = arith.constant 0.000000e+00 : f32
    %8 = vector.broadcast %cst_8 : f32 to vector<64x64xf32>
    %9 = arith.maximumf %7, %8 : vector<64x64xf32>
    %c0_9 = arith.constant 0 : index
    %c0_10 = arith.constant 0 : index
    %10 = vector.load %arg5[%c0_9, %c0_10] : memref<64x64xf32, #tpu.memory_space<vmem>>, vector<64x64xf32>
    %11 = arith.mulf %9, %10 : vector<64x64xf32>
    %c0_11 = arith.constant 0 : index
    %c0_12 = arith.constant 0 : index
    %12 = vector.load %arg6[%c0_11, %c0_12] : memref<64x256xf32, #tpu.memory_space<vmem>>, vector<64x256xf32>
    %cst_13 = arith.constant dense<0.000000e+00> : vector<64x256xf32>
    %13 = tpu.matmul %11, %12, %cst_13 {dimension_numbers = #tpu.dot_dimension_numbers<[1], [0], [0], [1], [0, 0, 1, 1], [], []>} : vector<64x64xf32>, vector<64x256xf32>, vector<64x256xf32> -> vector<64x256xf32>
    %14 = tpu.concatenate %13, %0 in 0 : vector<64x256xf32>, vector<8x256xf32> -> vector<72x256xf32>
    %c0_14 = arith.constant 0 : index
    %c0_15 = arith.constant 0 : index
    %15 = vector.load %arg7[%c0_14, %c0_15] : memref<144x72xf32, #tpu.memory_space<vmem>>, vector<144x72xf32>
    %cst_16 = arith.constant dense<0.000000e+00> : vector<144x256xf32>
    %16 = tpu.matmul %15, %14, %cst_16 {dimension_numbers = #tpu.dot_dimension_numbers<[1], [0], [0], [1], [0, 0, 1, 1], [], []>} : vector<144x72xf32>, vector<72x256xf32>, vector<144x256xf32> -> vector<144x256xf32>
    %17 = vector.extract_strided_slice %16 {offsets = [64, 0], sizes = [16, 256], strides = [1, 1]} : vector<144x256xf32> to vector<16x256xf32>
    %18 = vector.extract_strided_slice %16 {offsets = [0, 0], sizes = [16, 256], strides = [1, 1]} : vector<144x256xf32> to vector<16x256xf32>
    %c17_i32 = arith.constant 17 : i32
    %19 = tpu.dynamic_rotate %18 by %c17_i32 dim 1 : vector<16x256xf32>, i32 -> vector<16x256xf32>
    %c0_17 = arith.constant 0 : index
    %c0_18 = arith.constant 0 : index
    %c0_19 = arith.constant 0 : index
    %20 = vector.load %arg9[%c0_17, %c0_18, %c0_19] : memref<9x1x256xf32, #tpu.memory_space<vmem>>, vector<1x1x256xf32>
    %21 = vector.shape_cast %20 : vector<1x1x256xf32> to vector<1x256xf32>
    %22 = vector.broadcast %21 : vector<1x256xf32> to vector<16x256xf32>
    %23 = arith.mulf %19, %22 : vector<16x256xf32>
    %24 = arith.addf %17, %23 : vector<16x256xf32>
    %25 = vector.extract_strided_slice %16 {offsets = [16, 0], sizes = [16, 256], strides = [1, 1]} : vector<144x256xf32> to vector<16x256xf32>
    %c16_i32 = arith.constant 16 : i32
    %26 = tpu.dynamic_rotate %25 by %c16_i32 dim 1 : vector<16x256xf32>, i32 -> vector<16x256xf32>
    %c1 = arith.constant 1 : index
    %c0_20 = arith.constant 0 : index
    %c0_21 = arith.constant 0 : index
    %27 = vector.load %arg9[%c1, %c0_20, %c0_21] : memref<9x1x256xf32, #tpu.memory_space<vmem>>, vector<1x1x256xf32>
    %28 = vector.shape_cast %27 : vector<1x1x256xf32> to vector<1x256xf32>
    %29 = vector.broadcast %28 : vector<1x256xf32> to vector<16x256xf32>
    %30 = arith.mulf %26, %29 : vector<16x256xf32>
    %31 = arith.addf %24, %30 : vector<16x256xf32>
    %32 = vector.extract_strided_slice %16 {offsets = [32, 0], sizes = [16, 256], strides = [1, 1]} : vector<144x256xf32> to vector<16x256xf32>
    %c15_i32 = arith.constant 15 : i32
    %33 = tpu.dynamic_rotate %32 by %c15_i32 dim 1 : vector<16x256xf32>, i32 -> vector<16x256xf32>
    %c2 = arith.constant 2 : index
    %c0_22 = arith.constant 0 : index
    %c0_23 = arith.constant 0 : index
    %34 = vector.load %arg9[%c2, %c0_22, %c0_23] : memref<9x1x256xf32, #tpu.memory_space<vmem>>, vector<1x1x256xf32>
    %35 = vector.shape_cast %34 : vector<1x1x256xf32> to vector<1x256xf32>
    %36 = vector.broadcast %35 : vector<1x256xf32> to vector<16x256xf32>
    %37 = arith.mulf %33, %36 : vector<16x256xf32>
    %38 = arith.addf %31, %37 : vector<16x256xf32>
    %39 = vector.extract_strided_slice %16 {offsets = [48, 0], sizes = [16, 256], strides = [1, 1]} : vector<144x256xf32> to vector<16x256xf32>
    %c1_i32 = arith.constant 1 : i32
    %40 = tpu.dynamic_rotate %39 by %c1_i32 dim 1 : vector<16x256xf32>, i32 -> vector<16x256xf32>
    %c3 = arith.constant 3 : index
    %c0_24 = arith.constant 0 : index
    %c0_25 = arith.constant 0 : index
    %41 = vector.load %arg9[%c3, %c0_24, %c0_25] : memref<9x1x256xf32, #tpu.memory_space<vmem>>, vector<1x1x256xf32>
    %42 = vector.shape_cast %41 : vector<1x1x256xf32> to vector<1x256xf32>
    %43 = vector.broadcast %42 : vector<1x256xf32> to vector<16x256xf32>
    %44 = arith.mulf %40, %43 : vector<16x256xf32>
    %45 = arith.addf %38, %44 : vector<16x256xf32>
    %46 = vector.extract_strided_slice %16 {offsets = [80, 0], sizes = [16, 256], strides = [1, 1]} : vector<144x256xf32> to vector<16x256xf32>
    %c255_i32 = arith.constant 255 : i32
    %47 = tpu.dynamic_rotate %46 by %c255_i32 dim 1 : vector<16x256xf32>, i32 -> vector<16x256xf32>
    %c5 = arith.constant 5 : index
    %c0_26 = arith.constant 0 : index
    %c0_27 = arith.constant 0 : index
    %48 = vector.load %arg9[%c5, %c0_26, %c0_27] : memref<9x1x256xf32, #tpu.memory_space<vmem>>, vector<1x1x256xf32>
    %49 = vector.shape_cast %48 : vector<1x1x256xf32> to vector<1x256xf32>
    %50 = vector.broadcast %49 : vector<1x256xf32> to vector<16x256xf32>
    %51 = arith.mulf %47, %50 : vector<16x256xf32>
    %52 = arith.addf %45, %51 : vector<16x256xf32>
    %53 = vector.extract_strided_slice %16 {offsets = [96, 0], sizes = [16, 256], strides = [1, 1]} : vector<144x256xf32> to vector<16x256xf32>
    %c241_i32 = arith.constant 241 : i32
    %54 = tpu.dynamic_rotate %53 by %c241_i32 dim 1 : vector<16x256xf32>, i32 -> vector<16x256xf32>
    %c6 = arith.constant 6 : index
    %c0_28 = arith.constant 0 : index
    %c0_29 = arith.constant 0 : index
    %55 = vector.load %arg9[%c6, %c0_28, %c0_29] : memref<9x1x256xf32, #tpu.memory_space<vmem>>, vector<1x1x256xf32>
    %56 = vector.shape_cast %55 : vector<1x1x256xf32> to vector<1x256xf32>
    %57 = vector.broadcast %56 : vector<1x256xf32> to vector<16x256xf32>
    %58 = arith.mulf %54, %57 : vector<16x256xf32>
    %59 = arith.addf %52, %58 : vector<16x256xf32>
    %60 = vector.extract_strided_slice %16 {offsets = [112, 0], sizes = [16, 256], strides = [1, 1]} : vector<144x256xf32> to vector<16x256xf32>
    %c240_i32 = arith.constant 240 : i32
    %61 = tpu.dynamic_rotate %60 by %c240_i32 dim 1 : vector<16x256xf32>, i32 -> vector<16x256xf32>
    %c7 = arith.constant 7 : index
    %c0_30 = arith.constant 0 : index
    %c0_31 = arith.constant 0 : index
    %62 = vector.load %arg9[%c7, %c0_30, %c0_31] : memref<9x1x256xf32, #tpu.memory_space<vmem>>, vector<1x1x256xf32>
    %63 = vector.shape_cast %62 : vector<1x1x256xf32> to vector<1x256xf32>
    %64 = vector.broadcast %63 : vector<1x256xf32> to vector<16x256xf32>
    %65 = arith.mulf %61, %64 : vector<16x256xf32>
    %66 = arith.addf %59, %65 : vector<16x256xf32>
    %67 = vector.extract_strided_slice %16 {offsets = [128, 0], sizes = [16, 256], strides = [1, 1]} : vector<144x256xf32> to vector<16x256xf32>
    %c239_i32 = arith.constant 239 : i32
    %68 = tpu.dynamic_rotate %67 by %c239_i32 dim 1 : vector<16x256xf32>, i32 -> vector<16x256xf32>
    %c8 = arith.constant 8 : index
    %c0_32 = arith.constant 0 : index
    %c0_33 = arith.constant 0 : index
    %69 = vector.load %arg9[%c8, %c0_32, %c0_33] : memref<9x1x256xf32, #tpu.memory_space<vmem>>, vector<1x1x256xf32>
    %70 = vector.shape_cast %69 : vector<1x1x256xf32> to vector<1x256xf32>
    %71 = vector.broadcast %70 : vector<1x256xf32> to vector<16x256xf32>
    %72 = arith.mulf %68, %71 : vector<16x256xf32>
    %73 = arith.addf %66, %72 : vector<16x256xf32>
    %c0_34 = arith.constant 0 : index
    %c0_35 = arith.constant 0 : index
    %74 = vector.load %arg8[%c0_34, %c0_35] : memref<16x1xf32, #tpu.memory_space<vmem>>, vector<16x1xf32>
    %75 = vector.broadcast %74 : vector<16x1xf32> to vector<16x256xf32>
    %76 = arith.addf %73, %75 : vector<16x256xf32>
    %cst_36 = arith.constant 0.000000e+00 : f32
    %77 = vector.broadcast %cst_36 : f32 to vector<16x256xf32>
    %78 = arith.maximumf %76, %77 : vector<16x256xf32>
    %c0_37 = arith.constant 0 : index
    %c0_38 = arith.constant 0 : index
    %79 = vector.load %arg10[%c0_37, %c0_38] : memref<16x16xf32, #tpu.memory_space<vmem>>, vector<16x16xf32>
    %cst_39 = arith.constant dense<0.000000e+00> : vector<16x256xf32>
    %80 = tpu.matmul %79, %78, %cst_39 {dimension_numbers = #tpu.dot_dimension_numbers<[1], [0], [0], [1], [0, 0, 1, 1], [], []>} : vector<16x16xf32>, vector<16x256xf32>, vector<16x256xf32> -> vector<16x256xf32>
    %c0_40 = arith.constant 0 : index
    %c0_41 = arith.constant 0 : index
    %81 = vector.load %arg11[%c0_40, %c0_41] : memref<16x1xf32, #tpu.memory_space<vmem>>, vector<16x1xf32>
    %82 = vector.broadcast %81 : vector<16x1xf32> to vector<16x256xf32>
    %83 = arith.addf %80, %82 : vector<16x256xf32>
    %c0_42 = arith.constant 0 : index
    %c0_43 = arith.constant 0 : index
    %84 = vector.load %arg12[%c0_42, %c0_43] : memref<16x256xf32, #tpu.memory_space<vmem>>, vector<16x256xf32>
    tpu.vector_store %arg12[%c0_42, %c0_43], %83 {strides = array<i32>} : memref<16x256xf32, #tpu.memory_space<vmem>>, vector<16x256xf32>,
    return
  }
  func.func @transform_0(%arg0: i32) -> (i32, i32) {
    %c0_i32 = arith.constant 0 : i32
    %c0_i32_0 = arith.constant 0 : i32
    return %c0_i32, %arg0 : i32, i32
  }
  func.func @transform_1(%arg0: i32) -> (i32, i32) {
    %c0_i32 = arith.constant 0 : i32
    %c0_i32_0 = arith.constant 0 : i32
    %c0_i32_1 = arith.constant 0 : i32
    return %c0_i32, %c0_i32_0 : i32, i32
  }
  func.func @transform_2(%arg0: i32) -> (i32, i32) {
    %c0_i32 = arith.constant 0 : i32
    %c0_i32_0 = arith.constant 0 : i32
    %c0_i32_1 = arith.constant 0 : i32
    return %c0_i32, %c0_i32_0 : i32, i32
  }
  func.func @transform_3(%arg0: i32) -> (i32, i32) {
    %c0_i32 = arith.constant 0 : i32
    %c0_i32_0 = arith.constant 0 : i32
    %c0_i32_1 = arith.constant 0 : i32
    return %c0_i32, %c0_i32_0 : i32, i32
  }
  func.func @transform_4(%arg0: i32) -> (i32, i32) {
    %c0_i32 = arith.constant 0 : i32
    %c0_i32_0 = arith.constant 0 : i32
    %c0_i32_1 = arith.constant 0 : i32
    return %c0_i32, %c0_i32_0 : i32, i32
  }
  func.func @transform_5(%arg0: i32) -> (i32, i32) {
    %c0_i32 = arith.constant 0 : i32
    %c0_i32_0 = arith.constant 0 : i32
    %c0_i32_1 = arith.constant 0 : i32
    return %c0_i32, %c0_i32_0 : i32, i32
  }
  func.func @transform_6(%arg0: i32) -> (i32, i32) {
    %c0_i32 = arith.constant 0 : i32
    %c0_i32_0 = arith.constant 0 : i32
    %c0_i32_1 = arith.constant 0 : i32
    return %c0_i32, %c0_i32_0 : i32, i32
  }
  func.func @transform_7(%arg0: i32) -> (i32, i32) {
    %c0_i32 = arith.constant 0 : i32
    %c0_i32_0 = arith.constant 0 : i32
    %c0_i32_1 = arith.constant 0 : i32
    return %c0_i32, %c0_i32_0 : i32, i32
  }
  func.func @transform_8(%arg0: i32) -> (i32, i32, i32) {
    %c0_i32 = arith.constant 0 : i32
    %c0_i32_0 = arith.constant 0 : i32
    %c0_i32_1 = arith.constant 0 : i32
    %c0_i32_2 = arith.constant 0 : i32
    return %c0_i32, %c0_i32_0, %c0_i32_1 : i32, i32, i32
  }
  func.func @transform_9(%arg0: i32) -> (i32, i32) {
    %c0_i32 = arith.constant 0 : i32
    %c0_i32_0 = arith.constant 0 : i32
    %c0_i32_1 = arith.constant 0 : i32
    return %c0_i32, %c0_i32_0 : i32, i32
  }
  func.func @transform_10(%arg0: i32) -> (i32, i32) {
    %c0_i32 = arith.constant 0 : i32
    %c0_i32_0 = arith.constant 0 : i32
    %c0_i32_1 = arith.constant 0 : i32
    return %c0_i32, %c0_i32_0 : i32, i32
  }
  func.func @transform_11(%arg0: i32) -> (i32, i32) {
    %c0_i32 = arith.constant 0 : i32
    %c0_i32_0 = arith.constant 0 : i32
    return %c0_i32, %arg0 : i32, i32
  }
}

</mosaic_0001>

<bundles_post_ra>
// kernel: tpu_custom_call.1
= control target key start
LH: loop header
LB: loop body
LE: loop exit
PB: predicated region body
PF: predicated region fallthrough
CT: control target
= control target key end

     0   :  { %16 = vsyncpa [#allocation3], 0  ;;  %s2243_s0 = inlined_call_operand.vmem [shape: f32[8,512], index: 0, kind: input, shape index: {}]   ;;  %s2244_s1 = inlined_call_operand.vmem [shape: f32[64,8], index: 1, kind: input, shape index: {}]   ;;  %s2245_s2 = inlined_call_operand.vmem [shape: f32[256,64], index: 2, kind: input, shape index: {}]   ;;  %s2246_s3 = inlined_call_operand.vmem [shape: f32[64,1], index: 3, kind: input, shape index: {}]   ;;  %s2247_s4 = inlined_call_operand.vmem [shape: f32[64,64], index: 4, kind: input, shape index: {}]   ;;  %s2248_s5 = inlined_call_operand.vmem [shape: f32[64,256], index: 5, kind: input, shape index: {}]   ;;  %s2249_s6 = inlined_call_operand.vmem [shape: f32[144,72], index: 6, kind: input, shape index: {}]   ;;  %s2250_s7 = inlined_call_operand.vmem [shape: f32[16,1], index: 7, kind: input, shape index: {}]   ;;  %s2251_s8 = inlined_call_operand.vmem [shape: f32[9,1,256], index: 8, kind: input, shape index: {}]   ;;  %s2252_s9 = inlined_call_operand.vmem [shape: f32[16,16], index: 9, kind: input, shape index: {}]   ;;  %s2253_s10 = inlined_call_operand.vmem [shape: f32[16,1], index: 10, kind: input, shape index: {}]   ;;  %s2254_s11 = inlined_call_operand.hbm [shape: f32[16,512], index: 11, kind: output, shape index: {}]  }
   0x1   :  { %18 = vsyncpa [#allocation3 + $0x1], 0  ;;  %s1621_s17 = smov 0   ;;  %s1623_s18 = smov 0  }
   0x2   :  { %s1625_s19 = smov 0   ;;  %s1627_s20 = smov 0  }
   0x3 LB: > { %2257 = sst [smem:[#allocation5_spill]] %s1544_s19  ;;  %s1642_s21 = sadd.s32 4294967295, %s1548_s20   ;;  %s1548_s20 = sphi %s1627_s20, %s2266_s20   ;;  %s1544_s19 = sphi %s1625_s19, %s2263_s19   ;;  %s1540_s18 = sphi %s1623_s18, %s2265_s18   ;;  %s1536_s17 = sphi %s1621_s17, %s2264_s17  }
   0x4   : > { %s1340_s22 = sadd.s32 4294967294, %s1548_s20   ;;  %s1646_s23 = sadd.s32 1, %s1548_s20  }
   0x5   : > { %s267_s24 = sadd.s32 1, %s1544_s19  ;;  %s264_s25 = ssub.s32 %s1548_s20, %s1646_s23 }
   0x6   : > { %p277_p0 = scmp.ne.s32.totalorder %s1544_s19, %s1540_s18  ;;  %p265_p1 = scmp.eq.s32.totalorder %s264_s25, 0 }
   0x7   : > { %p278_p2 = scmp.eq.s32.totalorder %s1642_s21, 1  ;;  %p283_p3 = scmp.ne.s32.totalorder %s1540_s18, %s1536_s17 }
   0x8   : > { %p284_p4 = scmp.eq.s32.totalorder %s1340_s22, 1  ;;  %p1343_p7 = scmp.ge.s32.totalorder %s1548_s20, 1 }
   0x9   : > { %s1657_s26 = scalar_select %p265_p1, %s1544_s19, %s267_s24  }
   0xa   : > { %p1659_p5 = por %p278_p2, %p277_p0  ;;  %p1663_p6 = por %p284_p4, %p283_p3 }
   0xb   : > { %2258 = sst [smem:[#allocation6_spill]] %s1657_s26  ;;  %p341_p8 = scmp.lt.s32.totalorder %s1548_s20, 3 }
   0xd   : > { %p342_p9 = pnand %p1343_p7, %p341_p8 }
   0xe   : > { %s1345_s14 = sshll.u32 (!%p342_p9), %s1642_s21, 1  ;;  %s1551_s25 = smov (!%p342_p9), 17  }
   0xf   : > { %345 = sbr.rel (%p342_p9) target bundleno = 1087 (0x43f), region = 64  ;;  %p382_p10 = scmp.lt.s32.totalorder (!%p342_p9), %s1345_s14, 3 }
  0x10   : > { %s1552_s30 = smov (!%p342_p9), 1   ;;  %s2256_s12 = smov (!%p342_p9), 16  }
  0x11   : > { %s1554_s13 = smov (!%p342_p9), 15   ;;  %s1555_s15 = smov (!%p342_p9), 127  }
  0x12   : > { %s1556_s19 = smov (!%p342_p9), 113   ;;  %s1506_s16 = scalar_lea.hbm (!%p342_p9), %s2254_s11, 64 }
  0x14   : > { %v421_v0 = vld [vmem:[%s2245_s2 + $0xf8] sm:$0xff]  ;;  %v420_v1 = vld [vmem:[%s2245_s2 + $0xf0] sm:$0xff]  ;;  %v419_v4 = vld [vmem:[%s2245_s2 + $0xe8] sm:$0xff]  ;;  %s2268_s14 = smov (!%p382_p10, %s1345_s14), 3  ;;  %v1550_v34 = vmov 0   ;;  %vm518_vm0 = vcmask 64512  }
  0x15   : > { %442 = vmatpush.msra.mxu3 %v421_v0  ;;  %v405_v2 = vld [vmem:[%s2245_s2 + $0x78] sm:$0xff]  ;;  %v404_v3 = vld [vmem:[%s2245_s2 + $0x70] sm:$0xff]  ;;  %v403_v5 = vld [vmem:[%s2245_s2 + $0x68] sm:$0xff]  ;;  %s1346_s29 = sshll.u32 %s2268_s14, 3  ;;  %1483 = vset.pattern.permute.xlu0 %v1550_v34  ;;  %vm624_vm1 = vcmask 523264   ;;  %vm749_vm2 = vcmask 588800  }
  0x16   : > { %422 = vmatpush.msra.mxu0 %v405_v2  ;;  %v418_v6 = vld [vmem:[%s2245_s2 + $0xe0] sm:$0xff]  ;;  %v417_v8 = vld [vmem:[%s2245_s2 + $0xd8] sm:$0xff]  ;;  %v416_v10 = vld [vmem:[%s2245_s2 + $0xd0] sm:$0xff]  ;;  %s1712_s24 = scalar_lea.vmem %s2243_s0, %s1346_s29  ;;  %1484 = vset.pattern.permute.xlu1 %v1550_v34  ;;  %s1558_s29 = smov 111   ;;  %vm1205_vm11 = vcmask 130048  }
  0x17   : > { %443 = vmatpush.msra.mxu3 %v420_v1  ;;  %v402_v7 = vld [vmem:[%s2245_s2 + $0x60] sm:$0xff]  ;;  %v401_v9 = vld [vmem:[%s2245_s2 + $0x58] sm:$0xff]  ;;  %v400_v11 = vld [vmem:[%s2245_s2 + $0x50] sm:$0xff]  ;;  %1485 = vset.pattern.permute.xlu2 %v1550_v34 }
  0x18   : > { %423 = vmatpush.msra.mxu0 %v404_v3  ;;  %v415_v12 = vld [vmem:[%s2245_s2 + $0xc8] sm:$0xff]  ;;  %v388_v14 = vld [vmem:[%s1712_s24] sm:$0xff]  ;;  %v413_v17 = vld [vmem:[%s2245_s2 + $0xb8] sm:$0xff] }
  0x19   : > { %444 = vmatpush.msra.mxu3 %v419_v4  ;;  %v399_v13 = vld [vmem:[%s2245_s2 + $0x48] sm:$0xff]  ;;  %v414_v15 = vld [vmem:[%s2245_s2 + $0xc0] sm:$0xff]  ;;  %811 = vmatpush.msra.mxu1 %v388_v14  ;;  %v397_v18 = vld [vmem:[%s2245_s2 + $0x38] sm:$0xff] }
  0x1a   : > { %424 = vmatpush.msra.mxu0 %v403_v5  ;;  %v398_v16 = vld [vmem:[%s2245_s2 + $0x40] sm:$0xff]  ;;  %v412_v19 = vld [vmem:[%s2245_s2 + $0xb0] sm:$0xff]  ;;  %v411_v21 = vld [vmem:[%s2245_s2 + $0xa8] sm:$0xff] }
  0x1b   : > { %445 = vmatpush.msra.mxu3 %v418_v6  ;;  %v396_v20 = vld [vmem:[%s2245_s2 + $0x30] sm:$0xff]  ;;  %v395_v22 = vld [vmem:[%s2245_s2 + $0x28] sm:$0xff]  ;;  %v410_v23 = vld [vmem:[%s2245_s2 + $0xa0] sm:$0xff] }
  0x1c   : > { %425 = vmatpush.msra.mxu0 %v402_v7  ;;  %v394_v24 = vld [vmem:[%s2245_s2 + $0x20] sm:$0xff]  ;;  %v409_v25 = vld [vmem:[%s2245_s2 + $0x98] sm:$0xff]  ;;  %v408_v27 = vld [vmem:[%s2245_s2 + $0x90] sm:$0xff] }
  0x1d   : > { %446 = vmatpush.msra.mxu3 %v417_v8  ;;  %v393_v26 = vld [vmem:[%s2245_s2 + $0x18] sm:$0xff]  ;;  %v392_v28 = vld [vmem:[%s2245_s2 + $0x10] sm:$0xff]  ;;  %v407_v29 = vld [vmem:[%s2245_s2 + $0x88] sm:$0xff] }
  0x1e   : > { %426 = vmatpush.msra.mxu0 %v401_v9  ;;  %v391_v30 = vld [vmem:[%s2245_s2 + $0x8] sm:$0xff]  ;;  %v406_v31 = vld [vmem:[%s2245_s2 + $0x80] sm:$0xff]  ;;  %v472_v37 = vld [vmem:[%s2246_s3 + $0x10] sm:$0xff] }
  0x1f   : > { %447 = vmatpush.msra.mxu3 %v416_v10  ;;  %v1770_v32 = vld [vmem:[%s1712_s24 + $0x8] sm:$0xff]  ;;  %v390_v33 = vld [vmem:[%s2245_s2] sm:$0xff]  ;;  %v476_v38 = vld [vmem:[%s2246_s3 + $0x30] sm:$0xff]  ;;  %490 = vperm.xlu1 %1484, %v472_v37   ;;  %s1557_s24 = smov 112  }
  0x20   : > { %427 = vmatpush.msra.mxu0 %v400_v11  ;;  %v470_v35 = vld [vmem:[%s2246_s3] sm:$0xff]  ;;  %v471_v36 = vld [vmem:[%s2246_s3 + $0x8] sm:$0xff]  ;;  %v473_v39 = vld [vmem:[%s2246_s3 + $0x18] sm:$0xff] }
  0x21   : > { %448 = vmatpush.msra.mxu3 %v415_v12  ;;  %480 = vperm.xlu0 %1483, %v470_v35   ;;  %v462_v43 = vld [vmem:[%s2244_s1] sm:$0xff]  ;;  %v477_v44 = vld [vmem:[%s2246_s3 + $0x38] sm:$0xff]  ;;  %v463_v45 = vld [vmem:[%s2244_s1 + $0x8] sm:$0xff] }
  0x22   : > { %428 = vmatpush.msra.mxu0 %v399_v13  ;;  %v464_v46 = vld [vmem:[%s2244_s1 + $0x10] sm:$0xff]  ;;  %v465_v47 = vld [vmem:[%s2244_s1 + $0x18] sm:$0xff]  ;;  %v474_v48 = vld [vmem:[%s2246_s3 + $0x20] sm:$0xff] }
  0x23   : > { %449 = vmatpush.msra.mxu3 %v414_v15  ;;  %500 = vperm.xlu2 %1485, %v474_v48   ;;  %v466_v49 = vld [vmem:[%s2244_s1 + $0x20] sm:$0xff]  ;;  %v475_v50 = vld [vmem:[%s2246_s3 + $0x28] sm:$0xff]  ;;  %v468_v52 = vld [vmem:[%s2244_s1 + $0x30] sm:$0xff] }
  0x24   : > { %429 = vmatpush.msra.mxu0 %v398_v16  ;;  %v467_v51 = vld [vmem:[%s2244_s1 + $0x28] sm:$0xff]  ;;  %v469_v53 = vld [vmem:[%s2244_s1 + $0x38] sm:$0xff]  ;;  %v622_v54 = vld [vmem:[%s2248_s5 + $0x70] sm:$0xff] }
  0x25   : > { %450 = vmatpush.msra.mxu3 %v413_v17  ;;  %v623_v55 = vld [vmem:[%s2248_s5 + $0x78] sm:$0xff]  ;;  %v620_v56 = vld [vmem:[%s2248_s5 + $0x60] sm:$0xff]  ;;  %v621_v57 = vld [vmem:[%s2248_s5 + $0x68] sm:$0xff] }
  0x26   : > { %430 = vmatpush.msra.mxu0 %v397_v18  ;;  %v618_v58 = vld [vmem:[%s2248_s5 + $0x50] sm:$0xff]  ;;  %v619_v59 = vld [vmem:[%s2248_s5 + $0x58] sm:$0xff]  ;;  %v616_v60 = vld [vmem:[%s2248_s5 + $0x40] sm:$0xff] }
  0x27   : > { %451 = vmatpush.msra.mxu3 %v412_v19  ;;  %495 = vperm.xlu1 %1484, %v473_v39   ;;  %v617_v61 = vld [vmem:[%s2248_s5 + $0x48] sm:$0xff]  ;;  %v614_v62 = vld [vmem:[%s2248_s5 + $0x30] sm:$0xff]  ;;  %v615_v63 = vld [vmem:[%s2248_s5 + $0x38] sm:$0xff] }
  0x28   : > { %431 = vmatpush.msra.mxu0 %v396_v20  ;;  %v612_v0 = vld [vmem:[%s2248_s5 + $0x20] sm:$0xff]  ;;  %v613_v1 = vld [vmem:[%s2248_s5 + $0x28] sm:$0xff]  ;;  %v610_v2 = vld [vmem:[%s2248_s5 + $0x10] sm:$0xff] }
  0x29   : > { %452 = vmatpush.msra.mxu3 %v411_v21  ;;  %485 = vperm.xlu0 %1483, %v471_v36   ;;  %v611_v3 = vld [vmem:[%s2248_s5 + $0x18] sm:$0xff]  ;;  %v608_v4 = vld [vmem:[%s2248_s5] sm:$0xff]  ;;  %v609_v5 = vld [vmem:[%s2248_s5 + $0x8] sm:$0xff] }
  0x2a   : > { %432 = vmatpush.msra.mxu0 %v395_v22  ;;  %v592_v9 = vld [vmem:[%s2247_s4] sm:$0xff]  ;;  %v593_v15 = vld [vmem:[%s2247_s4 + $0x8] sm:$0xff]  ;;  %v594_v21 = vld [vmem:[%s2247_s4 + $0x10] sm:$0xff] }
  0x2b   : > { %453 = vmatpush.msra.mxu3 %v410_v23  ;;  %505 = vperm.xlu2 %1485, %v475_v50   ;;  %v597_v39 = vld [vmem:[%s2247_s4 + $0x28] sm:$0xff] }
  0x2c   : > { %433 = vmatpush.msra.mxu0 %v394_v24 }
  0x2d   : > { %454 = vmatpush.msra.mxu3 %v409_v25 }
  0x2e   : > { %434 = vmatpush.msra.mxu0 %v393_v26 }
  0x2f   : > { %455 = vmatpush.msra.mxu3 %v408_v27  ;;  %515 = vperm.xlu1 %1484, %v477_v44   ;;  %v595_v27 = vld [vmem:[%s2247_s4 + $0x18] sm:$0xff] }
  0x30   : > { %435 = vmatpush.msra.mxu0 %v392_v28 }
  0x31   : > { %456 = vmatpush.msra.mxu3 %v407_v29  ;;  %510 = vperm.xlu0 %1483, %v476_v38  }
  0x32   : > { %436 = vmatpush.msra.mxu0 %v391_v30 }
  0x33   : > { %457 = vmatpush.msra.mxu3 %v406_v31 }
  0x34   : > { %458 = vmatmul.f32.vlgmr.msra.gmra.mxu3 %v1770_v32  ;;  %437 = vmatpush.msra.mxu0 %v390_v33  ;;  %v596_v33 = vld [vmem:[%s2247_s4 + $0x20] sm:$0xff] }
  0x35   : > { %438 = vmatmul.f32.vlgmr.msra.gmra.mxu0 %v388_v14  ;;  %657 = vmatpush.msrb.mxu3 %v622_v54 }
  0x36   : > { %698 = vmatpush.msrb.mxu0 %v623_v55 }
  0x37   : > { %658 = vmatpush.msrb.mxu3 %v620_v56 }
  0x38   : > { %699 = vmatpush.msrb.mxu0 %v621_v57 }
  0x39   : > { %659 = vmatpush.msrb.mxu3 %v618_v58 }
  0x3a   : > { %700 = vmatpush.msrb.mxu0 %v619_v59 }
  0x3b   : > { %660 = vmatpush.msrb.mxu3 %v616_v60 }
  0x3c   : > { %701 = vmatpush.msrb.mxu0 %v617_v61 }
  0x3d   : > { %661 = vmatpush.msrb.mxu3 %v614_v62 }
  0x3e   : > { %702 = vmatpush.msrb.mxu0 %v615_v63 }
  0x3f   : > { %662 = vmatpush.msrb.mxu3 %v612_v0 }
  0x40   : > { %703 = vmatpush.msrb.mxu0 %v613_v1 }
  0x41   : > { %663 = vmatpush.msrb.mxu3 %v610_v2 }
  0x42   : > { %704 = vmatpush.msrb.mxu0 %v611_v3 }
  0x43   : > { %664 = vmatpush.msrb.mxu3 %v608_v4 }
  0x44   : > { %705 = vmatpush.msrb.mxu0 %v609_v5 }
  0x46   : > { %882 = vmatpush.msra.mxu0 %v1770_v32 }
  0x7d   : > { %v501_v30 = vpop.permute.xlu2 %500 }
  0x85   : > { %v506_v36 = vpop.permute.xlu2 %505 }
  0x91   : > { %v491_v18 = vpop.permute.xlu1 %490 }
  0x93   : > { %v481_v6 = vpop.permute.xlu0 %480 }
  0x99   : > { %v496_v24 = vpop.permute.xlu1 %495 }
  0x9b   : > { %v486_v12 = vpop.permute.xlu0 %485 }
  0xa1   : > { %v516_v48 = vpop.permute.xlu1 %515 }
  0xb2   : > { %v439_v40 = vpop.f32.mrf.mxu0 }
  0xb7   : > { %v459_v41 = vpop.f32.mrf.mxu3 }
  0xb8   : > { %v460_v42 = vadd.f32 %v459_v41, %v439_v40 }
  0xba   : > { %558 = vmatpush.msra.mxu2 %v460_v42  ;;  %v511_v42 = vpop.permute.xlu0 %510 }
  0xbb   : > { %1347 = vmatmul.msk.f32.vlgmr.msra.gmra.mxu2 %vm518_vm0, %v462_v43 }
  0xbc   : > { %1424 = vmatpush.msrb.mxu2 %v1770_v32 }
  0xc3   : > { %1348 = vmatmul.msk.f32.gmra.mxu2 %vm518_vm0, %v463_v45  ;;  %v598_v45 = vld [vmem:[%s2247_s4 + $0x30] sm:$0xff] }
  0xcb   : > { %1349 = vmatmul.msk.f32.gmra.mxu2 %vm518_vm0, %v464_v46 }
  0xd3   : > { %1350 = vmatmul.msk.f32.gmra.mxu2 %vm518_vm0, %v465_v47 }
  0xdb   : > { %1351 = vmatmul.msk.f32.gmra.mxu2 %vm518_vm0, %v466_v49 }
  0xe3   : > { %1352 = vmatmul.msk.f32.gmra.mxu2 %vm518_vm0, %v467_v51  ;;  %v599_v51 = vld [vmem:[%s2247_s4 + $0x38] sm:$0xff] }
  0xeb   : > { %1353 = vmatmul.msk.f32.gmra.mxu2 %vm518_vm0, %v468_v52 }
  0xf3   : > { %1354 = vmatmul.msk.f32.gmra.mxu2 %vm518_vm0, %v469_v53 }
 0x13e   : > { %v560_v7 = vpop.f32.mrf.mxu2 }
 0x13f   : > { %v561_v8 = vadd.f32 %v560_v7, %v481_v6  ;;  %v731_v6 = vld [vmem:[%s2249_s6] sm:$0xff]  ;;  %v737_v7 = vld [vmem:[%s2249_s6 + $0x30] sm:$0xff] }
 0x141   : > { %v584_v10 = vmax.f32 %v561_v8, 0.0  ;;  %v732_v8 = vld [vmem:[%s2249_s6 + $0x8] sm:$0xff] }
 0x143   : > { %v600_v11 = vmul.f32 %v592_v9, %v584_v10  ;;  %v738_v9 = vld [vmem:[%s2249_s6 + $0x38] sm:$0xff]  ;;  %v733_v10 = vld [vmem:[%s2249_s6 + $0x10] sm:$0xff] }
 0x145   : > { %1355 = vmatmul.msk.f32.vlgmr.msrb.gmra.mxu3 %vm624_vm1, %v600_v11  ;;  %1363 = vmatmul.msk.f32.vlgmr.msrb.gmra.mxu0 %vm624_vm1, %v600_v11  ;;  %v739_v11 = vld [vmem:[%s2249_s6 + $0x40] sm:$0xff] }
 0x146   : > { %v563_v13 = vpop.f32.mrf.mxu2 }
 0x147   : > { %v564_v14 = vadd.f32 %v563_v13, %v486_v12  ;;  %v734_v12 = vld [vmem:[%s2249_s6 + $0x18] sm:$0xff]  ;;  %v740_v13 = vld [vmem:[%s2249_s6 + $0x48] sm:$0xff] }
 0x149   : > { %v585_v16 = vmax.f32 %v564_v14, 0.0  ;;  %v735_v14 = vld [vmem:[%s2249_s6 + $0x20] sm:$0xff] }
 0x14b   : > { %v601_v17 = vmul.f32 %v593_v15, %v585_v16  ;;  %v741_v15 = vld [vmem:[%s2249_s6 + $0x50] sm:$0xff]  ;;  %v742_v16 = vld [vmem:[%s2249_s6 + $0x58] sm:$0xff] }
 0x14d   : > { %1356 = vmatmul.msk.f32.gmra.mxu3 %vm624_vm1, %v601_v17  ;;  %1364 = vmatmul.msk.f32.gmra.mxu0 %vm624_vm1, %v601_v17  ;;  %v736_v17 = vld [vmem:[%s2249_s6 + $0x28] sm:$0xff] }
 0x14e   : > { %v566_v19 = vpop.f32.mrf.mxu2 }
 0x14f   : > { %v567_v20 = vadd.f32 %v566_v19, %v491_v18  ;;  %v743_v18 = vld [vmem:[%s2249_s6 + $0x60] sm:$0xff]  ;;  %v744_v19 = vld [vmem:[%s2249_s6 + $0x68] sm:$0xff] }
 0x151   : > { %v586_v22 = vmax.f32 %v567_v20, 0.0  ;;  %v745_v20 = vld [vmem:[%s2249_s6 + $0x70] sm:$0xff] }
 0x153   : > { %v602_v23 = vmul.f32 %v594_v21, %v586_v22  ;;  %v746_v21 = vld [vmem:[%s2249_s6 + $0x78] sm:$0xff]  ;;  %v747_v22 = vld [vmem:[%s2249_s6 + $0x80] sm:$0xff] }
 0x155   : > { %1357 = vmatmul.msk.f32.gmra.mxu3 %vm624_vm1, %v602_v23  ;;  %1365 = vmatmul.msk.f32.gmra.mxu0 %vm624_vm1, %v602_v23  ;;  %v748_v23 = vld [vmem:[%s2249_s6 + $0x88] sm:$0xff] }
 0x156   : > { %v569_v25 = vpop.f32.mrf.mxu2 }
 0x157   : > { %v570_v26 = vadd.f32 %v569_v25, %v496_v24 }
 0x159   : > { %v587_v28 = vmax.f32 %v570_v26, 0.0 }
 0x15b   : > { %v603_v29 = vmul.f32 %v595_v27, %v587_v28 }
 0x15d   : > { %1358 = vmatmul.msk.f32.gmra.mxu3 %vm624_vm1, %v603_v29  ;;  %1366 = vmatmul.msk.f32.gmra.mxu0 %vm624_vm1, %v603_v29 }
 0x15e   : > { %v572_v31 = vpop.f32.mrf.mxu2 }
 0x15f   : > { %v573_v32 = vadd.f32 %v572_v31, %v501_v30 }
 0x161   : > { %v588_v34 = vmax.f32 %v573_v32, 0.0 }
 0x163   : > { %v604_v35 = vmul.f32 %v596_v33, %v588_v34 }
 0x165   : > { %1359 = vmatmul.msk.f32.gmra.mxu3 %vm624_vm1, %v604_v35  ;;  %1367 = vmatmul.msk.f32.gmra.mxu0 %vm624_vm1, %v604_v35 }
 0x166   : > { %v575_v37 = vpop.f32.mrf.mxu2 }
 0x167   : > { %v576_v38 = vadd.f32 %v575_v37, %v506_v36 }
 0x169   : > { %v589_v40 = vmax.f32 %v576_v38, 0.0 }
 0x16b   : > { %v605_v41 = vmul.f32 %v597_v39, %v589_v40 }
 0x16d   : > { %1360 = vmatmul.msk.f32.gmra.mxu3 %vm624_vm1, %v605_v41  ;;  %1368 = vmatmul.msk.f32.gmra.mxu0 %vm624_vm1, %v605_v41 }
 0x16e   : > { %v578_v43 = vpop.f32.mrf.mxu2 }
 0x16f   : > { %v579_v44 = vadd.f32 %v578_v43, %v511_v42 }
 0x171   : > { %v590_v46 = vmax.f32 %v579_v44, 0.0 }
 0x173   : > { %v606_v47 = vmul.f32 %v598_v45, %v590_v46 }
 0x175   : > { %1361 = vmatmul.msk.f32.gmra.mxu3 %vm624_vm1, %v606_v47  ;;  %1369 = vmatmul.msk.f32.gmra.mxu0 %vm624_vm1, %v606_v47 }
 0x176   : > { %v581_v49 = vpop.f32.mrf.mxu2 }
 0x177   : > { %v582_v50 = vadd.f32 %v581_v49, %v516_v48 }
 0x179   : > { %v591_v52 = vmax.f32 %v582_v50, 0.0 }
 0x17b   : > { %v607_v53 = vmul.f32 %v599_v51, %v591_v52 }
 0x17d   : > { %1362 = vmatmul.msk.f32.gmra.mxu3 %vm624_vm1, %v607_v53  ;;  %1370 = vmatmul.msk.f32.gmra.mxu0 %vm624_vm1, %v607_v53 }
 0x1c2   : > { %v707_v54 = vpop.f32.mrf.mxu0 }
 0x1c8   : > { %v666_v55 = vpop.f32.mrf.mxu3 }
 0x1ca   : > { %v710_v56 = vpop.f32.mrf.mxu0 }
 0x1d0   : > { %v669_v57 = vpop.f32.mrf.mxu3 }
 0x1d2   : > { %v713_v58 = vpop.f32.mrf.mxu0 }
 0x1d8   : > { %v672_v59 = vpop.f32.mrf.mxu3 }
 0x1da   : > { %v716_v60 = vpop.f32.mrf.mxu0 }
 0x1e0   : > { %v675_v61 = vpop.f32.mrf.mxu3 }
 0x1e2   : > { %v719_v62 = vpop.f32.mrf.mxu0 }
 0x1e8   : > { %v678_v63 = vpop.f32.mrf.mxu3 }
 0x1ea   : > { %v722_v0 = vpop.f32.mrf.mxu0 }
 0x1f0   : > { %v681_v1 = vpop.f32.mrf.mxu3 }
 0x1f2   : > { %v725_v2 = vpop.f32.mrf.mxu0 }
 0x1f8   : > { %v684_v3 = vpop.f32.mrf.mxu3 }
 0x1fa   : > { %v728_v4 = vpop.f32.mrf.mxu0 }
 0x1fb   : > { %883 = vmatpush.msra.mxu0 %v728_v4  ;;  %1425 = vmatpush.msrb.mxu2 %v728_v4  ;;  %v1172_v4 = vld [vmem:[%s2250_s7 + $0x8] sm:$0xff] }
 0x1fd   : > { %884 = vmatpush.msra.mxu0 %v725_v2  ;;  %1426 = vmatpush.msrb.mxu2 %v725_v2 }
 0x1ff   : > { %885 = vmatpush.msra.mxu0 %v722_v0  ;;  %1427 = vmatpush.msrb.mxu2 %v722_v0 }
 0x200   : > { %v687_v5 = vpop.f32.mrf.mxu3 }
 0x201   : > { %812 = vmatpush.msra.mxu1 %v687_v5  ;;  %886 = vmatpush.msra.mxu0 %v719_v62 }
 0x202   : > { %1428 = vmatpush.msrb.mxu2 %v719_v62 }
 0x203   : > { %813 = vmatpush.msra.mxu1 %v684_v3  ;;  %887 = vmatpush.msra.mxu0 %v716_v60 }
 0x204   : > { %1429 = vmatpush.msrb.mxu2 %v716_v60 }
 0x205   : > { %814 = vmatpush.msra.mxu1 %v681_v1  ;;  %888 = vmatpush.msra.mxu0 %v713_v58 }
 0x206   : > { %1430 = vmatpush.msrb.mxu2 %v713_v58 }
 0x207   : > { %815 = vmatpush.msra.mxu1 %v678_v63  ;;  %889 = vmatpush.msra.mxu0 %v710_v56 }
 0x208   : > { %1431 = vmatpush.msrb.mxu2 %v710_v56 }
 0x209   : > { %816 = vmatpush.msra.mxu1 %v675_v61  ;;  %890 = vmatpush.msra.mxu0 %v707_v54 }
 0x20a   : > { %1432 = vmatpush.msrb.mxu2 %v707_v54  ;;  %1389 = vmatmul.msk.f32.vlgmr.msra.gmra.mxu0 %vm749_vm2, %v731_v6 }
 0x20b   : > { %817 = vmatpush.msra.mxu1 %v672_v59  ;;  %1395 = vmatmul.msk.f32.vlgmr.msrb.gmra.mxu2 %vm749_vm2, %v737_v7  ;;  %v2034_v59 = vld [vmem:[%s2251_s8] sm:$0x3] }
 0x20c   : > { %v963_v61 = vperm.slane %v2034_v59, 0 }
 0x20d   : > { %818 = vmatpush.msra.mxu1 %v669_v57  ;;  %v954_v57 = vlaneseq }
 0x20f   : > { %819 = vmatpush.msra.mxu1 %v666_v55  ;;  %v2029_v58 = vand.u32 127, %v954_v57 }
 0x210   : > { %1371 = vmatmul.msk.f32.vlgmr.msra.gmra.mxu1 %vm749_vm2, %v731_v6 }
 0x211   : > { %vm956_vm3 = vcmp.lt.s32.totalorder %v2029_v58, 17  ;;  %vm983_vm4 = vcmp.lt.s32.totalorder %v2029_v58, 16  ;;  %vm1039_vm5 = vcmp.lt.s32.totalorder %v2029_v58, 1  ;;  %vm1011_vm6 = vcmp.lt.s32.totalorder %v2029_v58, 15 }
 0x212   : > { %1390 = vmatmul.msk.f32.gmra.mxu0 %vm749_vm2, %v732_v8  ;;  %vm1067_vm7 = vcmp.lt.s32.totalorder %v2029_v58, 127  ;;  %vm1095_vm8 = vcmp.lt.s32.totalorder %v2029_v58, 113  ;;  %vm1123_vm9 = vcmp.lt.s32.totalorder %v2029_v58, 112  ;;  %vm1151_vm10 = vcmp.lt.s32.totalorder %v2029_v58, 111 }
 0x213   : > { %1396 = vmatmul.msk.f32.gmra.mxu2 %vm749_vm2, %v738_v9 }
 0x218   : > { %1372 = vmatmul.msk.f32.gmra.mxu1 %vm749_vm2, %v732_v8 }
 0x21a   : > { %1391 = vmatmul.msk.f32.gmra.mxu0 %vm749_vm2, %v733_v10 }
 0x21b   : > { %1397 = vmatmul.msk.f32.gmra.mxu2 %vm749_vm2, %v739_v11 }
 0x220   : > { %1373 = vmatmul.msk.f32.gmra.mxu1 %vm749_vm2, %v733_v10 }
 0x222   : > { %1392 = vmatmul.msk.f32.gmra.mxu0 %vm749_vm2, %v734_v12 }
 0x223   : > { %1398 = vmatmul.msk.f32.gmra.mxu2 %vm749_vm2, %v740_v13 }
 0x228   : > { %1374 = vmatmul.msk.f32.gmra.mxu1 %vm749_vm2, %v734_v12 }
 0x22a   : > { %1393 = vmatmul.msk.f32.gmra.mxu0 %vm749_vm2, %v735_v14 }
 0x22b   : > { %1399 = vmatmul.msk.f32.gmra.mxu2 %vm749_vm2, %v741_v15 }
 0x230   : > { %1375 = vmatmul.msk.f32.gmra.mxu1 %vm749_vm2, %v735_v14 }
 0x232   : > { %1394 = vmatmul.msk.f32.gmra.mxu0 %vm749_vm2, %v736_v17 }
 0x233   : > { %1400 = vmatmul.msk.f32.gmra.mxu2 %vm749_vm2, %v742_v16 }
 0x238   : > { %1376 = vmatmul.msk.f32.gmra.mxu1 %vm749_vm2, %v736_v17 }
 0x23b   : > { %1401 = vmatmul.msk.f32.gmra.mxu2 %vm749_vm2, %v743_v18 }
 0x240   : > { %1377 = vmatmul.msk.f32.gmra.mxu1 %vm749_vm2, %v737_v7 }
 0x243   : > { %1402 = vmatmul.msk.f32.gmra.mxu2 %vm749_vm2, %v744_v19 }
 0x248   : > { %1378 = vmatmul.msk.f32.gmra.mxu1 %vm749_vm2, %v738_v9  ;;  %v1194_v9 = vld [vmem:[%s2253_s10 + $0x8] sm:$0xff] }
 0x24b   : > { %1403 = vmatmul.msk.f32.gmra.mxu2 %vm749_vm2, %v745_v20 }
 0x250   : > { %1379 = vmatmul.msk.f32.gmra.mxu1 %vm749_vm2, %v739_v11 }
 0x253   : > { %1404 = vmatmul.msk.f32.gmra.mxu2 %vm749_vm2, %v746_v21 }
 0x258   : > { %1380 = vmatmul.msk.f32.gmra.mxu1 %vm749_vm2, %v740_v13  ;;  %v1171_v13 = vld [vmem:[%s2250_s7] sm:$0xff] }
 0x25b   : > { %1405 = vmatmul.msk.f32.gmra.mxu2 %vm749_vm2, %v747_v22 }
 0x260   : > { %1381 = vmatmul.msk.f32.gmra.mxu1 %vm749_vm2, %v741_v15 }
 0x263   : > { %1406 = vmatmul.msk.f32.gmra.mxu2 %vm749_vm2, %v748_v23 }
 0x268   : > { %1382 = vmatmul.msk.f32.gmra.mxu1 %vm749_vm2, %v742_v16  ;;  %v964_v16 = vperm.slane %v2034_v59, 1 }
 0x270   : > { %1383 = vmatmul.msk.f32.gmra.mxu1 %vm749_vm2, %v743_v18  ;;  %v2074_v18 = vld [vmem:[%s2251_s8 + $0x2] sm:$0x3] }
 0x278   : > { %1384 = vmatmul.msk.f32.gmra.mxu1 %vm749_vm2, %v744_v19 }
 0x280   : > { %1385 = vmatmul.msk.f32.gmra.mxu1 %vm749_vm2, %v745_v20  ;;  %v992_v20 = vperm.slane %v2074_v18, 1 }
 0x287   : > { %v892_v24 = vpop.f32.mrf.mxu0 }
 0x288   : > { %950 = vrot.lane.b32.xlu2 %v892_v24, %s1551_s25  ;;  %1386 = vmatmul.msk.f32.gmra.mxu1 %vm749_vm2, %v746_v21 }
 0x28d   : > { %v821_v25 = vpop.f32.mrf.mxu1 }
 0x28e   : > { %946 = vrot.lane.b32.xlu1 %v821_v25, %s1551_s25  ;;  %v910_v26 = vpop.f32.mrf.mxu2 }
 0x28f   : > { %v895_v27 = vpop.f32.mrf.mxu0 }
 0x290   : > { %1035 = vrot.lane.b32.xlu2 %v910_v26, %s1552_s30  ;;  %952 = vrot.lane.b32.xlu0 %v895_v27, %s1551_s25 }
 0x291   : > { %1387 = vmatmul.msk.f32.gmra.mxu1 %vm749_vm2, %v747_v22 }
 0x295   : > { %v824_v28 = vpop.f32.mrf.mxu1 }
 0x296   : > { %v913_v29 = vpop.f32.mrf.mxu2 }
 0x297   : > { %v898_v30 = vpop.f32.mrf.mxu0 }
 0x298   : > { %1037 = vrot.lane.b32.xlu0 %v913_v29, %s1552_s30  ;;  %948 = vrot.lane.b32.xlu2 %v824_v28, %s1551_s25  ;;  %v1193_v28 = vld [vmem:[%s2253_s10] sm:$0xff] }
 0x299   : > { %1388 = vmatmul.msk.f32.gmra.mxu1 %vm749_vm2, %v748_v23  ;;  %v2090_v29 = vld [vmem:[%s2251_s8 + $0x6] sm:$0x3] }
 0x29d   : > { %v827_v31 = vpop.f32.mrf.mxu1 }
 0x29e   : > { %v2014_v32 = vpop.f32.mrf.mxu2 }
 0x29f   : > { %v901_v33 = vpop.f32.mrf.mxu0 }
 0x2a0   : > { %979 = vrot.lane.b32.xlu0 %v898_v30, %s2256_s12  ;;  %975 = vrot.lane.b32.xlu2 %v827_v31, %s2256_s12  ;;  %v1408_v30 = vld [vmem:[%s2251_s8 + $0x4] sm:$0x3] }
 0x2a1   : > { %981 = vrot.lane.b32.xlu1 %v901_v33, %s2256_s12  ;;  %v1048_v33 = vperm.slane %v2090_v29, 1 }
 0x2a5   : > { %v830_v34 = vpop.f32.mrf.mxu1 }
 0x2a6   : > { %v2019_v35 = vpop.f32.mrf.mxu2 }
 0x2a7   : > { %v904_v36 = vpop.f32.mrf.mxu0 }
 0x2a8   : > { %977 = vrot.lane.b32.xlu0 %v830_v34, %s2256_s12  ;;  %v1020_v34 = vperm.slane %v1408_v30, 1 }
 0x2a9   : > { %1007 = vrot.lane.b32.xlu1 %v904_v36, %s1554_s13 }
 0x2ad   : > { %v833_v37 = vpop.f32.mrf.mxu1 }
 0x2ae   : > { %v922_v38 = vpop.f32.mrf.mxu2 }
 0x2af   : > { %v907_v39 = vpop.f32.mrf.mxu0 }
 0x2b0   : > { %1003 = vrot.lane.b32.xlu0 %v833_v37, %s1554_s13  ;;  %1009 = vrot.lane.b32.xlu2 %v907_v39, %s1554_s13 }
 0x2b5   : > { %v836_v40 = vpop.f32.mrf.mxu1 }
 0x2b6   : > { %1005 = vrot.lane.b32.xlu1 %v836_v40, %s1554_s13  ;;  %v925_v41 = vpop.f32.mrf.mxu2  ;;  %s378_s13 = sand.u32 1, %s1540_s18  }
 0x2b8   : > { %1063 = vrot.lane.b32.xlu0 %v922_v38, %s1555_s15 }
 0x2bd   : > { %v839_v42 = vpop.f32.mrf.mxu1 }
 0x2be   : > { %1065 = vrot.lane.b32.xlu1 %v925_v41, %s1555_s15  ;;  %v928_v43 = vpop.f32.mrf.mxu2 }
 0x2c5   : > { %v842_v44 = vpop.f32.mrf.mxu1 }
 0x2c6   : > { %1031 = vrot.lane.b32.xlu1 %v839_v42, %s1552_s30  ;;  %1033 = vrot.lane.b32.xlu2 %v842_v44, %s1552_s30  ;;  %v931_v45 = vpop.f32.mrf.mxu2  ;;  %v991_v42 = vperm.slane %v2074_v18, 0  ;;  %s1263_s30 = scalar_lea.sflag [#allocation3], %s378_s13 }
 0x2cd   : > { %v845_v46 = vpop.f32.mrf.mxu1 }
 0x2ce   : > { %1093 = vrot.lane.b32.xlu2 %v931_v45, %s1556_s19  ;;  %v934_v47 = vpop.f32.mrf.mxu2  ;;  %1091 = vrot.lane.b32.xlu1 %v928_v43, %s1556_s19 }
 0x2d5   : > { %v2024_v48 = vpop.f32.mrf.mxu1 }
 0x2d6   : > { %1119 = vrot.lane.b32.xlu2 %v934_v47, %s1557_s24  ;;  %v937_v49 = vpop.f32.mrf.mxu2 }
 0x2d7   : > { %1121 = vrot.lane.b32.xlu0 %v937_v49, %s1557_s24  ;;  %v1019_v49 = vperm.slane %v1408_v30, 0 }
 0x2dd   : > { %v851_v50 = vpop.f32.mrf.mxu1 }
 0x2de   : > { %1059 = vrot.lane.b32.xlu2 %v851_v50, %s1555_s15  ;;  %v940_v51 = vpop.f32.mrf.mxu2 }
 0x2e2   : > { %v951_v56 = vpop.permute.xlu2 %950 }
 0x2e5   : > { %v854_v52 = vpop.f32.mrf.mxu1 }
 0x2e6   : > { %1061 = vrot.lane.b32.xlu0 %v854_v52, %s1555_s15  ;;  %v943_v53 = vpop.f32.mrf.mxu2  ;;  %s1344_s15 = sshll.u32 %s378_s13, 5 }
 0x2e7   : > { %1149 = vrot.lane.b32.xlu1 %v943_v53, %s1558_s29 }
 0x2ea   : > { %v2039_v62 = vpop.permute.xlu2 %1035 }
 0x2ed   : > { %v857_v54 = vpop.f32.mrf.mxu1 }
 0x2ee   : > { %1087 = vrot.lane.b32.xlu0 %v857_v54, %s1556_s19 }
 0x2f2   : > { %v2053_v7 = vpop.permute.xlu2 %948 }
 0x2f5   : > { %v860_v55 = vpop.f32.mrf.mxu1 }
 0x2f6   : > { %1089 = vrot.lane.b32.xlu1 %v860_v55, %s1556_s19  ;;  %s380_s19 = scalar_lea.vmem [#allocation2], %s1344_s15 }
 0x2f7   : > { %s1275_s14 = sshll.u32 %s380_s19, 4  ;;  %s1276_s14 = int_to_ptr.vmem [resolvable:$true] %s1275_s14 }
 0x2fa   : > { %v976_v12 = vpop.permute.xlu2 %975 }
 0x2fd   : > { %v863_v60 = vpop.f32.mrf.mxu1 }
 0x2fe   : > { %1115 = vrot.lane.b32.xlu1 %v863_v60, %s1557_s24 }
 0x300   : > { %v947_v63 = vpop.permute.xlu1 %946 }
 0x301   : > { %v957_v0 = vsel %vm956_vm3, %v947_v63, %v951_v56  ;;  %v959_v1 = vsel %vm956_vm3, %v951_v56, %v947_v63  ;;  %v1047_v63 = vperm.slane %v2090_v29, 0 }
 0x302   : > { %v967_v2 = vmul.f32 %v963_v61, %v959_v1  ;;  %v2047_v3 = vpop.permute.xlu0 %952  ;;  %v968_v47 = vmul.f32 %v964_v16, %v957_v0 }
 0x303   : > { %v958_v15 = vsel %vm956_vm3, %v2053_v7, %v2047_v3 }
 0x304   : > { %v971_v5 = vadd.f32 %v967_v2, %v845_v46  ;;  %v970_v19 = vmul.f32 %v964_v16, %v958_v15  ;;  %v972_v54 = vadd.f32 %v968_v47, %v2014_v32 }
 0x305   : > { %v866_v6 = vpop.f32.mrf.mxu1 }
 0x306   : > { %1180 = vperm.xlu1 %1484, %v1172_v4   ;;  %1117 = vrot.lane.b32.xlu2 %v866_v6, %s1557_s24  ;;  %v974_v23 = vadd.f32 %v970_v19, %v2019_v35  ;;  %s1423_s24 = sshll.u32 %s1642_s21, 4 }
 0x307   : > { %s1274_s26 = scalar_lea.hbm %s2254_s11, %s1423_s24 }
 0x308   : > { %s1277_s25 = sshll.u32 %s1274_s26, 4  ;;  %s1278_s25 = int_to_ptr.hbm [resolvable:$true] %s1277_s25 }
 0x30a   : > { %v2055_v8 = vpop.permute.xlu0 %1037  ;;  %v1010_v24 = vpop.permute.xlu2 %1009 }
 0x30e   : > { %v869_v10 = vpop.f32.mrf.mxu1  ;;  %1202 = vperm.xlu1 %1484, %v1194_v9  }
 0x30f   : > { %1143 = vrot.lane.b32.xlu2 %v869_v10, %s1558_s29 }
 0x312   : > { %v980_v11 = vpop.permute.xlu0 %979 }
 0x313   : > { %v2064_v14 = vpop.permute.xlu1 %981  ;;  %v984_v45 = vsel %vm983_vm4, %v976_v12, %v980_v11  ;;  %v986_v46 = vsel %vm983_vm4, %v980_v11, %v976_v12 }
 0x314   : > { %v995_v52 = vmul.f32 %v991_v42, %v986_v46  ;;  %v996_v53 = vmul.f32 %v992_v20, %v984_v45 }
 0x316   : > { %v872_v17 = vpop.f32.mrf.mxu1  ;;  %v999_v57 = vadd.f32 %v995_v52, %v971_v5  ;;  %v1000_v60 = vadd.f32 %v996_v53, %v972_v54 }
 0x317   : > { %1175 = vperm.xlu2 %1485, %v1171_v13   ;;  %1145 = vrot.lane.b32.xlu0 %v872_v17, %s1558_s29 }
 0x31a   : > { %v978_v21 = vpop.permute.xlu0 %977 }
 0x31b   : > { %v985_v22 = vsel %vm983_vm4, %v978_v21, %v2064_v14  ;;  %v1008_v27 = vpop.permute.xlu1 %1007  ;;  %v987_v18 = vsel %vm983_vm4, %v2064_v14, %v978_v21  ;;  %v1411_v14 = vld [vmem:[%s2251_s8 + $0xc] sm:$0x3] }
 0x31c   : > { %v998_v25 = vmul.f32 %v992_v20, %v985_v22 }
 0x31e   : > { %v1002_v26 = vadd.f32 %v998_v25, %v974_v23  ;;  %v997_v23 = vmul.f32 %v991_v42, %v987_v18 }
 0x31f   : > { %1147 = vrot.lane.b32.xlu0 %v940_v51, %s1558_s29  ;;  %s1500_s29 = sshra.s32 %s1278_s25, 4  ;;  %s1501_s29 = int_to_ptr.hbm [resolvable:$true] %s1500_s29 }
 0x320   : > { %v1034_v31 = vpop.permute.xlu2 %1033  ;;  %s1502_s15 = scalar_lea.hbm %s1501_s29, 32  ;;  %p1507_p0 = scmp.lt.s32.totalorder %s1501_s29, %s2254_s11 }
 0x321   : > { %v1041_v36 = vsel %vm1039_vm5, %v1034_v31, %v2055_v8  ;;  %v1043_v59 = vsel %vm1039_vm5, %v2055_v8, %v1034_v31  ;;  %v1412_v8 = vld [vmem:[%s2251_s8 + $0xe] sm:$0x3]  ;;  %p1503_p11 = scmp.ne.s32.totalorder %s1501_s29, %s1502_s15  ;;  %p1508_p1 = scmp.lt.s32.totalorder %s1506_s16, %s1502_s15 }
 0x322   : > { %v1054_v39 = vmul.f32 %v1048_v33, %v1041_v36  ;;  %v1004_v43 = vpop.permute.xlu0 %1003  ;;  %v1053_v29 = vmul.f32 %v1047_v63, %v1043_v59  ;;  %v1131_v45 = vperm.slane %v1412_v8, 0 }
 0x323   : > { %v1012_v50 = vsel %vm1011_vm6, %v1004_v43, %v1008_v27  ;;  %v1014_v51 = vsel %vm1011_vm6, %v1008_v27, %v1004_v43  ;;  %p1504_p12 = pnand %p1503_p11, %p1659_p5  ;;  %p1509_p2 = por %p1508_p1, %p1507_p0 }
 0x324   : > { %v1023_v55 = vmul.f32 %v1019_v49, %v1014_v51  ;;  %v1024_v56 = vmul.f32 %v1020_v34, %v1012_v50  ;;  %v1104_v50 = vperm.slane %v1411_v14, 1 }
 0x325   : > { %p1505_p13 = pneg %p1504_p12 }
 0x326   : > { %v1027_v4 = vadd.f32 %v1023_v55, %v999_v57  ;;  %v1028_v6 = vadd.f32 %v1024_v56, %v1000_v60 }
 0x327   : > { %1197 = vperm.xlu0 %1483, %v1193_v28   ;;  %p1510_p3 = pnand %p1509_p2, %p1505_p13 }
 0x328   : > { %v1006_v35 = vpop.permute.xlu1 %1005  ;;  %v1094_v12 = vpop.permute.xlu2 %1093 }
 0x329   : > { %v1013_v37 = vsel %vm1011_vm6, %v1006_v35, %v1010_v24  ;;  %v1015_v22 = vsel %vm1011_vm6, %v1010_v24, %v1006_v35 }
 0x32a   : > { %v1026_v38 = vmul.f32 %v1020_v34, %v1013_v37  ;;  %v1064_v5 = vpop.permute.xlu0 %1063  ;;  %v1025_v28 = vmul.f32 %v1019_v49, %v1015_v22 }
 0x32c   : > { %v1030_v40 = vadd.f32 %v1026_v38, %v1002_v26 }
 0x32e   : > { %v2103_v41 = vadd.f32 %v1054_v39, %v1030_v40  ;;  %v1413_v40 = vld [vmem:[%s2251_s8 + $0x10] sm:$0x3] }
 0x32f   : > { %v1159_v52 = vperm.slane %v1413_v40, 0 }
 0x330   : > { %v1066_v44 = vpop.permute.xlu1 %1065  ;;  %v2128_v16 = vpop.permute.xlu2 %1119 }
 0x338   : > { %v1032_v1 = vpop.permute.xlu1 %1031  ;;  %v1060_v25 = vpop.permute.xlu2 %1059 }
 0x339   : > { %v1040_v0 = vsel %vm1039_vm5, %v1032_v1, %v2039_v62  ;;  %v1042_v2 = vsel %vm1039_vm5, %v2039_v62, %v1032_v1  ;;  %v960_v62 = vsel %vm956_vm3, %v2047_v3, %v2053_v7  ;;  %v1410_v3 = vld [vmem:[%s2251_s8 + $0xa] sm:$0x3]  ;;  %v1068_v42 = vsel %vm1067_vm7, %v1060_v25, %v1064_v5 }
 0x33a   : > { %v1051_v9 = vmul.f32 %v1047_v63, %v1042_v2  ;;  %v1052_v10 = vmul.f32 %v1048_v33, %v1040_v0  ;;  %v969_v19 = vmul.f32 %v963_v61, %v960_v62  ;;  %v1075_v21 = vperm.slane %v1410_v3, 0 }
 0x33b   : > { %v1103_v33 = vperm.slane %v1411_v14, 0  ;;  %v1076_v38 = vperm.slane %v1410_v3, 1  ;;  %v1070_v46 = vsel %vm1067_vm7, %v1064_v5, %v1060_v25  ;;  %v1132_v0 = vperm.slane %v1412_v8, 1 }
 0x33c   : > { %v2122_v32 = vadd.f32 %v1051_v9, %v1027_v4  ;;  %v2124_v11 = vadd.f32 %v1052_v10, %v1028_v6  ;;  %v973_v27 = vadd.f32 %v969_v19, %v2024_v48  ;;  %v1079_v53 = vmul.f32 %v1075_v21, %v1068_v42 }
 0x33d   : > { %v1080_v54 = vmul.f32 %v1076_v38, %v1070_v46  ;;  %v1160_v9 = vperm.slane %v1413_v40, 1 }
 0x33e   : > { %v1001_v7 = vadd.f32 %v997_v23, %v973_v27  ;;  %v1083_v22 = vadd.f32 %v1079_v53, %v2122_v32 }
 0x33f   : > { %v1084_v23 = vadd.f32 %v1080_v54, %v2124_v11 }
 0x340   : > { %v1092_v13 = vpop.permute.xlu1 %1091  ;;  %v1029_v48 = vadd.f32 %v1025_v28, %v1001_v7 }
 0x342   : > { %v1057_v35 = vadd.f32 %v1053_v29, %v1029_v48 }
 0x349   : > { %v2126_v15 = vpop.permute.xlu0 %1121 }
 0x358   : > { %v1062_v20 = vpop.permute.xlu0 %1061 }
 0x359   : > { %v2130_v17 = vpop.permute.xlu1 %1149  ;;  %v1069_v61 = vsel %vm1067_vm7, %v1062_v20, %v1066_v44  ;;  %v1071_v36 = vsel %vm1067_vm7, %v1066_v44, %v1062_v20 }
 0x35a   : > { %v1081_v30 = vmul.f32 %v1075_v21, %v1069_v61  ;;  %v1082_v47 = vmul.f32 %v1076_v38, %v1071_v36  ;;  %v1191_v36 = vld [vmem:[%s2252_s9] sm:$0xff] }
 0x35c   : > { %v1085_v43 = vadd.f32 %v1081_v30, %v1057_v35  ;;  %v1086_v63 = vadd.f32 %v1082_v47, %v2103_v41 }
 0x360   : > { %v1088_v34 = vpop.permute.xlu0 %1087  ;;  %v1118_v31 = vpop.permute.xlu2 %1117 }
 0x361   : > { %v1125_v44 = vsel %vm1123_vm9, %v1118_v31, %v2126_v15  ;;  %v1096_v55 = vsel %vm1095_vm8, %v1088_v34, %v1092_v13  ;;  %v1098_v1 = vsel %vm1095_vm8, %v1092_v13, %v1088_v34  ;;  %v1127_v41 = vsel %vm1123_vm9, %v2126_v15, %v1118_v31 }
 0x362   : > { %v1137_v56 = vmul.f32 %v1131_v45, %v1125_v44  ;;  %v1107_v5 = vmul.f32 %v1103_v33, %v1096_v55  ;;  %v1108_v18 = vmul.f32 %v1104_v50, %v1098_v1  ;;  %v1138_v27 = vmul.f32 %v1132_v0, %v1127_v41 }
 0x364   : > { %v1111_v7 = vadd.f32 %v1107_v5, %v1083_v22  ;;  %v1112_v59 = vadd.f32 %v1108_v18, %v1084_v23 }
 0x368   : > { %v1090_v26 = vpop.permute.xlu1 %1089 }
 0x369   : > { %v1097_v24 = vsel %vm1095_vm8, %v1090_v26, %v1094_v12  ;;  %v1099_v49 = vsel %vm1095_vm8, %v1094_v12, %v1090_v26  ;;  %v1144_v12 = vpop.permute.xlu2 %1143 }
 0x36a   : > { %v1109_v37 = vmul.f32 %v1103_v33, %v1097_v24  ;;  %v1110_v57 = vmul.f32 %v1104_v50, %v1099_v49 }
 0x36c   : > { %v1113_v51 = vadd.f32 %v1109_v37, %v1085_v43  ;;  %v1114_v19 = vadd.f32 %v1110_v57, %v1086_v63 }
 0x36e   : > { %v1141_v6 = vadd.f32 %v1137_v56, %v1113_v51 }
 0x370   : > { %v1116_v39 = vpop.permute.xlu1 %1115 }
 0x371   : > { %v1124_v4 = vsel %vm1123_vm9, %v1116_v39, %v2128_v16  ;;  %v1126_v13 = vsel %vm1123_vm9, %v2128_v16, %v1116_v39  ;;  %v1142_v16 = vadd.f32 %v1138_v27, %v1114_v19  ;;  %v1176_v34 = vpop.permute.xlu2 %1175  ;;  %v1192_v39 = vld [vmem:[%s2252_s9 + $0x8] sm:$0xff] }
 0x372   : > { %v1135_v25 = vmul.f32 %v1131_v45, %v1124_v4  ;;  %v1136_v15 = vmul.f32 %v1132_v0, %v1126_v13 }
 0x374   : > { %v1139_v48 = vadd.f32 %v1135_v25, %v1111_v7  ;;  %v1140_v21 = vadd.f32 %v1136_v15, %v1112_v59 }
 0x378   : > { %v1181_v26 = vpop.permute.xlu1 %1180 }
 0x380   : > { %v1203_v45 = vpop.permute.xlu1 %1202 }
 0x389   : > { %v1146_v60 = vpop.permute.xlu0 %1145 }
 0x38a   : > { %v1153_v2 = vsel %vm1151_vm10, %v1146_v60, %v2130_v17  ;;  %v1155_v62 = vsel %vm1151_vm10, %v2130_v17, %v1146_v60 }
 0x38b   : > { %v1165_v10 = vmul.f32 %v1159_v52, %v1153_v2  ;;  %v1166_v28 = vmul.f32 %v1160_v9, %v1155_v62 }
 0x38d   : > { %v1169_v20 = vadd.f32 %v1165_v10, %v1141_v6  ;;  %v1170_v11 = vadd.f32 %v1166_v28, %v1142_v16 }
 0x38f   : > { %v1185_v3 = vadd.f32 %v1181_v26, %v1169_v20  ;;  %v1186_v8 = vadd.f32 %v1181_v26, %v1170_v11 }
 0x391   : > { %v1189_v61 = vmax.f32 %v1185_v3, 0.0  ;;  %v1148_v14 = vpop.permute.xlu0 %1147  ;;  %v1190_v58 = vmax.f32 %v1186_v8, 0.0 }
 0x392   : > { %v1152_v17 = vsel %vm1151_vm10, %v1144_v12, %v1148_v14  ;;  %v1154_v32 = vsel %vm1151_vm10, %v1148_v14, %v1144_v12 }
 0x393   : > { %v1163_v24 = vmul.f32 %v1159_v52, %v1152_v17  ;;  %v1164_v29 = vmul.f32 %v1160_v9, %v1154_v32  ;;  %1226 = vmatpush.msra.mxu3 %v1189_v61 }
 0x395   : > { %v1167_v30 = vadd.f32 %v1163_v24, %v1139_v48  ;;  %v1168_v33 = vadd.f32 %v1164_v29, %v1140_v21 }
 0x397   : > { %v1183_v31 = vadd.f32 %v1176_v34, %v1167_v30  ;;  %v1184_v37 = vadd.f32 %v1176_v34, %v1168_v33 }
 0x399   : > { %v1187_v35 = vmax.f32 %v1183_v31, 0.0  ;;  %v1188_v38 = vmax.f32 %v1184_v37, 0.0  ;;  %v1198_v40 = vpop.permute.xlu0 %1197 }
 0x39b   : > { %1227 = vmatpush.msra.mxu3 %v1187_v35 }
 0x39c   : > { %1414 = vmatmul.msk.f32.vlgmr.msra.gmra.mxu3 %vm1205_vm11, %v1191_v36 }
 0x39d   : > { %1249 = vmatpush.msrb.mxu3 %v1190_v58 }
 0x39f   : > { %1250 = vmatpush.msrb.mxu3 %v1188_v38 }
 0x3a4   : > { %1415 = vmatmul.msk.f32.gmra.mxu3 %vm1205_vm11, %v1192_v39 }
 0x3ac   : > { %1416 = vmatmul.msk.f32.vlgmr.msrb.gmra.mxu3 %vm1205_vm11, %v1191_v36 }
 0x3b4   : > { %1417 = vmatmul.msk.f32.gmra.mxu3 %vm1205_vm11, %v1192_v39 }
 0x41f   : > { %v1229_v42 = vpop.f32.mrf.mxu3 }
 0x420   : > { %v1230_v43 = vadd.f32 %v1229_v42, %v1198_v40 }
 0x422   : > { %1258 = vst [vmem:[%s380_s19] sm:$0xff] %v1230_v43 }
 0x427   : > { %v1232_v46 = vpop.f32.mrf.mxu3 }
 0x428   : > { %v1233_v47 = vadd.f32 %v1232_v46, %v1203_v45 }
 0x42a   : > { %1260 = vst [vmem:[%s380_s19 + $0x10] sm:$0xff] %v1233_v47 }
 0x42f   : > { %v1252_v44 = vpop.f32.mrf.mxu3 }
 0x430   : > { %v1253_v49 = vadd.f32 %v1252_v44, %v1198_v40 }
 0x432   : > { %1259 = vst [vmem:[%s380_s19 + $0x8] sm:$0xff] %v1253_v49 }
 0x437   : > { %v1255_v50 = vpop.f32.mrf.mxu3 }
 0x438   : > { %v1256_v51 = vadd.f32 %v1255_v50, %v1203_v45 }
 0x43a   : > { %1261 = vst [vmem:[%s380_s19 + $0x18] sm:$0xff] %v1256_v51 }
 0x43b   : > { %1513 = shalt.err (!%p1510_p3)
}
 0x43c   : > { %s1559_s13 = smov 256   ;;  %s1560_s19 = smov 512  }
 0x43d   : > { %s2261_s26 = smov 16  }
 0x43e   : > { %1433 = dma.vmem_to_hbm [thread:$0]  (%p1659_p5), %s1276_s14, 512, %s1278_s25, %s1263_s30, %s1559_s13, %s1560_s19, %s2261_s26  }
 0x43f PF: > { %p1439_p4 = scmp.ge.s32.totalorder %s1548_s20, 2  ;;  %s1292_s12 = sand.u32 1, %s1536_s17  }
 0x440   : > { %s1293_s29 = scalar_lea.sflag [#allocation3], %s1292_s12 }
 0x441   : > { %p1436_p7 = pnand %p1439_p4, %p1663_p6 }
 0x443   : > { %p1437_p8 = pneg %p1436_p7 }
 0x445   : > { %1531 = dma.done.wait (%p1437_p8), %s1293_s29, 512  }
 0x446   : > { %1533 = vsyncadd (%p1437_p8), %s1293_s29, 4294966784  ;;  %s2262_s15 = sld [smem:[#allocation5_spill]]  ;;  %p21_p9 = scmp.ge.s32.totalorder %s1646_s23, 4  }
 0x447   : > { %s2263_s19 = sld [smem:[#allocation6_spill]]  ;;  %s2264_s17 = smov %s1540_s18 }
 0x448   : > { %s2266_s20 = smov %s1646_s23  ;;  %23 = sbr.rel (!%p21_p9) target bundleno = 3 (0x3), region = 106 }
 0x44c   : > { %s2265_s18 = smov %s2262_s15 }
 0x44d   :  { %1299 = vsyncpa [#allocation3], 1 }
 0x44e   :  { %1301 = vsyncpa [#allocation3 + $0x1], 1 }

</bundles_post_ra>
